<compile_context>
chip_gen: v6e
topology: v6e:2x2x1
jax: 0.10.0
libtpu: 0.0.40
codegen_flags: <defaults>
</compile_context>

<pallas_src>
import jax
import jax.numpy as jnp
from jax.experimental import pallas as pl
from jax.experimental.pallas import tpu as pltpu


# ---------------------------------------------------------------------------
# Kernel: one (TB, T) batch-row tile -> per-row partial numerator/denominator.
# T is never tiled, so the right-shifted mask (roll + col==0 patch) is exact.
# ---------------------------------------------------------------------------
def _reward_criterion_kernel(inp_ref, seq_ref, rew_ref, num_ref, den_ref):
    inp = inp_ref[...].astype(jnp.float32)          # (TB, T) sampled log-probs
    rew = rew_ref[...].astype(jnp.float32)          # (TB, T) per-token reward
    tb, t = inp.shape

    # Token mask, then shift right by one column; the circular wrap of column
    # T-1 into column 0 is overwritten by the col==0 patch (mask[:, 0] = 1).
    tok = (seq_ref[...] > 0).astype(jnp.float32)    # (TB, T)
    rolled = pltpu.roll(tok, shift=1, axis=1)       # XLU rotate (free-ish slot)
    col = jax.lax.broadcasted_iota(jnp.int32, (tb, t), 1)
    mask = jnp.where(col == 0, jnp.float32(1.0), rolled)

    # Per-row partial sums; the tiny cross-tile reduce + divide is in the wrapper.
    num_ref[...] = jnp.sum(-inp * rew * mask, axis=1, keepdims=True)  # (TB, 1)
    den_ref[...] = jnp.sum(mask, axis=1, keepdims=True)               # (TB, 1)


# ---------------------------------------------------------------------------
# Tile-size / VMEM budgeting helpers.
# ---------------------------------------------------------------------------
def _sublane_multiple(*dtypes):
    """Required sublane multiple for the narrowest input dtype."""
    m = 8
    for dt in dtypes:
        it = max(1, jnp.dtype(dt).itemsize)
        m = max(m, 8 * max(1, 4 // it))             # 4B->8, 2B->16, 1B->32
    return m


def _vmem_budgets():
    """(tile_budget_bytes, vmem_limit_bytes) derived from the chip's VMEM."""
    cap = None
    try:
        cap = getattr(pltpu.get_tpu_info(), "vmem_capacity_bytes", None)
    except Exception:
        cap = None
    if not cap:
        cap = 64 << 20                              # conservative: v7x per-TC
    tile_budget = min(cap // 4, 32 << 20)           # 16 MiB v7x, 32 MiB v5e/v6e
    vmem_limit = int(min((cap * 3) // 5, 96 << 20)) # ~38 MiB v7x, ~76 MiB v5e/v6e
    vmem_limit = max(vmem_limit, 32 << 20)
    return tile_budget, vmem_limit


def _divisors(n):
    ds = []
    i = 1
    while i * i <= n:
        if n % i == 0:
            ds.append(i)
            ds.append(n // i)
        i += 1
    return ds


def _choose_block_rows(batch, seq_len, dtypes, tile_budget):
    """Pick (tile_rows, pad_rows).  Prefers no padding; padding is a fallback."""
    sub = _sublane_multiple(*dtypes)
    in_bytes = sum(jnp.dtype(d).itemsize for d in dtypes)
    # double-buffered inputs + ~4 live f32 tile-sized temporaries in the kernel
    bytes_per_row = seq_len * (2 * in_bytes + 4 * 4)
    max_tb = max(sub, tile_budget // max(bytes_per_row, 1))

    # Pad-free candidates: divisors of batch that are sublane multiples.
    cands = sorted(d for d in _divisors(batch) if d % sub == 0 and d <= max_tb)
    full_ok = batch <= max_tb

    # Prefer >= 2 tiles when there is enough work to split across TensorCores
    # (v7x megacore); only if it costs nothing (i.e. a pad-free split exists).
    if batch * seq_len * in_bytes >= (2 << 20):
        split = [d for d in cands if batch // d >= 2]
        if split:
            return split[-1], 0

    if full_ok:
        return batch, 0                             # single full-batch block
    if cands:
        return cands[-1], 0

    # Last resort: pad the batch to a multiple of a sublane-aligned tile.
    tb = max(sub, (max_tb // sub) * sub)
    allowance = max(sub, batch // 8)
    for _ in range(64):
        if tb <= sub or (-batch) % tb <= allowance:
            break
        tb -= sub
    tb = max(tb, sub)
    return tb, (-batch) % tb


# ---------------------------------------------------------------------------
# Wrapper.
# ---------------------------------------------------------------------------
def reward_criterion(inp, seq, reward, *, block_rows=None):
    """inp: (B, T) float, seq: (B, T) int/bool, reward: (B, T) float -> scalar f32."""
    batch, seq_len = inp.shape
    dtypes = (inp.dtype, seq.dtype, reward.dtype)
    sub = _sublane_multiple(*dtypes)
    tile_budget, vmem_limit = _vmem_budgets()

    if block_rows is None:
        tb, pad_rows = _choose_block_rows(batch, seq_len, dtypes, tile_budget)
    else:
        tb = int(block_rows)
        if tb != batch and tb % sub != 0:
            raise ValueError(f"block_rows={tb} must be a multiple of {sub} "
                             f"or equal to batch={batch}")
        pad_rows = (-batch) % tb

    b_pad = batch + pad_rows
    if pad_rows:  # rare fallback; padded rows are corrected exactly below
        pad = ((0, pad_rows), (0, 0))
        inp = jnp.pad(inp, pad)
        reward = jnp.pad(reward, pad)
        seq = jnp.pad(seq, pad)
    n_tiles = b_pad // tb

    num_parts, den_parts = pl.pallas_call(
        _reward_criterion_kernel,
        out_shape=(
            jax.ShapeDtypeStruct((b_pad, 1), jnp.float32),
            jax.ShapeDtypeStruct((b_pad, 1), jnp.float32),
        ),
        grid_spec=pltpu.PrefetchScalarGridSpec(
            num_scalar_prefetch=0,
            grid=(n_tiles,),
            in_specs=[
                pl.BlockSpec((tb, seq_len), lambda i: (i, 0)),
                pl.BlockSpec((tb, seq_len), lambda i: (i, 0)),
                pl.BlockSpec((tb, seq_len), lambda i: (i, 0)),
            ],
            out_specs=[
                pl.BlockSpec((tb, 1), lambda i: (i, 0)),
                pl.BlockSpec((tb, 1), lambda i: (i, 0)),
            ],
        ),
        compiler_params=pltpu.CompilerParams(
            dimension_semantics=("parallel",),
            vmem_limit_bytes=vmem_limit,
        ),
    )(inp, seq, reward)

    num = jnp.sum(num_parts)
    # Each zero-padded row contributes exactly 1.0 to den (mask col 0) and 0.0
    # to num (inp/reward padded with 0), so the correction below is exact.
    den = jnp.sum(den_parts) - jnp.float32(pad_rows)
    return num / den


def reward_criterion_ref(inp, seq, reward):
    mask = (seq > 0).astype(jnp.float32)
    mask = jnp.concatenate(
        [jnp.ones((mask.shape[0], 1), jnp.float32), mask[:, :-1]], axis=1)
    return (jnp.sum(-inp.astype(jnp.float32) * reward.astype(jnp.float32) * mask)
            / jnp.sum(mask))


if __name__ == "__main__":
    def _case(key, b, t, **kw):
        k1, k2, k3 = jax.random.split(key, 3)
        inp = jax.random.normal(k1, (b, t), dtype=jnp.float32)
        seq = jax.random.randint(k2, (b, t), minval=0, maxval=5, dtype=jnp.int32)
        rew = jax.random.normal(k3, (b, t), dtype=jnp.float32)
        out = jax.block_until_ready(reward_criterion(inp, seq, rew, **kw))
        ref = reward_criterion_ref(inp, seq, rew)
        assert jnp.allclose(out, ref, rtol=1e-5, atol=1e-5), (b, t, kw, out, ref)

    root = jax.random.PRNGKey(0)
    k_a, k_b, k_c, k_d = jax.random.split(root, 4)

    # 1) Tiny batch: single full-batch block (4, 16) -- no padding, no casts.
    _case(k_a, 4, 16)
    # 2) Batch with no 8-multiple divisor: single full-batch block (20, 128).
    _case(k_b, 20, 128)
    # 3) Multi-tile, pad-free path: 3 blocks of 8 rows.
    _case(k_c, 24, 64, block_rows=8)
    # 4) Padding fallback path (20 -> 24 rows) with wrapper-side den correction.
    _case(k_d, 20, 128, block_rows=8)

    print("KERNEL_OK")
</pallas_src>

<mosaic_0001>
module attributes {stable_mosaic.version = 11 : i64} {
  func.func @_reward_criterion_kernel(%arg0: i32, %arg1: memref<4x16xf32, #tpu.memory_space<vmem>>, %arg2: memref<4x16xi32, #tpu.memory_space<vmem>>, %arg3: memref<4x16xf32, #tpu.memory_space<vmem>>, %arg4: memref<4x1xf32, #tpu.memory_space<vmem>>, %arg5: memref<4x1xf32, #tpu.memory_space<vmem>>) attributes {dimension_semantics = [#tpu.dimension_semantics<parallel>], iteration_bounds = array<i64: 1>, scalar_prefetch = 0 : i64, scratch_operands = 0 : i64, tpu.core_type = #tpu.core_type<tc>, window_params = [{transform_indices = @transform_0, window_bounds = array<i64: 4, 16>}, {transform_indices = @transform_1, window_bounds = array<i64: 4, 16>}, {transform_indices = @transform_2, window_bounds = array<i64: 4, 16>}, {transform_indices = @transform_3, window_bounds = array<i64: 4, 1>}, {transform_indices = @transform_4, window_bounds = array<i64: 4, 1>}]} {
    %c0 = arith.constant 0 : index
    %c0_0 = arith.constant 0 : index
    %0 = vector.load %arg1[%c0, %c0_0] : memref<4x16xf32, #tpu.memory_space<vmem>>, vector<4x16xf32>
    %c0_1 = arith.constant 0 : index
    %c0_2 = arith.constant 0 : index
    %1 = vector.load %arg3[%c0_1, %c0_2] : memref<4x16xf32, #tpu.memory_space<vmem>>, vector<4x16xf32>
    %c0_3 = arith.constant 0 : index
    %c0_4 = arith.constant 0 : index
    %2 = vector.load %arg2[%c0_3, %c0_4] : memref<4x16xi32, #tpu.memory_space<vmem>>, vector<4x16xi32>
    %c0_i32 = arith.constant 0 : i32
    %3 = vector.broadcast %c0_i32 : i32 to vector<4x16xi32>
    %4 = arith.cmpi sgt, %2, %3 : vector<4x16xi32>
    %5 = arith.extui %4 : vector<4x16xi1> to vector<4x16xi32>
    %6 = arith.sitofp %5 : vector<4x16xi32> to vector<4x16xf32>
    %c1_i32 = arith.constant 1 : i32
    %7 = tpu.dynamic_rotate %6 by %c1_i32 dim 1 : vector<4x16xf32>, i32 -> vector<4x16xf32>
    %8 = tpu.iota {dimensions = array<i32: 1>} : vector<4x16xi32>
    %c0_i32_5 = arith.constant 0 : i32
    %9 = vector.broadcast %c0_i32_5 : i32 to vector<4x16xi32>
    %10 = arith.cmpi eq, %8, %9 : vector<4x16xi32>
    %cst = arith.constant 1.000000e+00 : f32
    %11 = vector.broadcast %cst : f32 to vector<4x16xf32>
    %12 = arith.select %10, %11, %7 : vector<4x16xi1>, vector<4x16xf32>
    %cst_6 = arith.constant 0.000000e+00 : f32
    %13 = vector.broadcast %cst_6 : f32 to vector<4x16xf32>
    %14 = arith.subf %13, %0 : vector<4x16xf32>
    %15 = arith.mulf %14, %1 : vector<4x16xf32>
    %16 = arith.mulf %15, %12 : vector<4x16xf32>
    %cst_7 = arith.constant dense<0.000000e+00> : vector<4xf32>
    %17 = vector.multi_reduction <add>, %16, %cst_7 [1] : vector<4x16xf32> to vector<4xf32>
    %18 = vector.shape_cast %17 : vector<4xf32> to vector<4x1xf32>
    %c0_8 = arith.constant 0 : index
    %c0_9 = arith.constant 0 : index
    %19 = vector.load %arg4[%c0_8, %c0_9] : memref<4x1xf32, #tpu.memory_space<vmem>>, vector<4x1xf32>
    tpu.vector_store %arg4[%c0_8, %c0_9], %18 {strides = array<i32>} : memref<4x1xf32, #tpu.memory_space<vmem>>, vector<4x1xf32>,
    %cst_10 = arith.constant dense<0.000000e+00> : vector<4xf32>
    %20 = vector.multi_reduction <add>, %12, %cst_10 [1] : vector<4x16xf32> to vector<4xf32>
    %21 = vector.shape_cast %20 : vector<4xf32> to vector<4x1xf32>
    %c0_11 = arith.constant 0 : index
    %c0_12 = arith.constant 0 : index
    %22 = vector.load %arg5[%c0_11, %c0_12] : memref<4x1xf32, #tpu.memory_space<vmem>>, vector<4x1xf32>
    tpu.vector_store %arg5[%c0_11, %c0_12], %21 {strides = array<i32>} : memref<4x1xf32, #tpu.memory_space<vmem>>, vector<4x1xf32>,
    return
  }
  func.func @transform_0(%arg0: i32) -> (i32, i32) {
    %c0_i32 = arith.constant 0 : i32
    %c0_i32_0 = arith.constant 0 : i32
    return %arg0, %c0_i32 : i32, i32
  }
  func.func @transform_1(%arg0: i32) -> (i32, i32) {
    %c0_i32 = arith.constant 0 : i32
    %c0_i32_0 = arith.constant 0 : i32
    return %arg0, %c0_i32 : i32, i32
  }
  func.func @transform_2(%arg0: i32) -> (i32, i32) {
    %c0_i32 = arith.constant 0 : i32
    %c0_i32_0 = arith.constant 0 : i32
    return %arg0, %c0_i32 : i32, i32
  }
  func.func @transform_3(%arg0: i32) -> (i32, i32) {
    %c0_i32 = arith.constant 0 : i32
    %c0_i32_0 = arith.constant 0 : i32
    return %arg0, %c0_i32 : i32, i32
  }
  func.func @transform_4(%arg0: i32) -> (i32, i32) {
    %c0_i32 = arith.constant 0 : i32
    %c0_i32_0 = arith.constant 0 : i32
    return %arg0, %c0_i32 : i32, i32
  }
}

</mosaic_0001>

<bundles_post_ra>
// kernel: tpu_custom_call.1
= control target key start
LH: loop header
LB: loop body
LE: loop exit
PB: predicated region body
PF: predicated region fallthrough
CT: control target
= control target key end

     0   :  { %10 = vsyncpa [#allocation3], 0  ;;  %s212_s0 = inlined_call_operand.hbm [shape: f32[4,16], index: 0, kind: input, shape index: {}]   ;;  %s213_s1 = inlined_call_operand.hbm [shape: s32[4,16], index: 1, kind: input, shape index: {}]   ;;  %s214_s2 = inlined_call_operand.hbm [shape: f32[4,16], index: 2, kind: input, shape index: {}]   ;;  %s215_s3 = inlined_call_operand.vmem [shape: f32[4,1], index: 3, kind: output, shape index: {0}]   ;;  %s216_s4 = inlined_call_operand.vmem [shape: f32[4,1], index: 4, kind: output, shape index: {1}]  }
   0x1   :  { %11 = vsyncpa [#allocation5], 0  ;;  %s166_s15 = smov [#allocation4]   ;;  %s167_s17 = smov [#allocation2]  }
   0x2   :  { %s28_s16 = sshll.u32 %s166_s15, 4  ;;  %s18_s18 = sshll.u32 %s167_s17, 4  ;;  %s29_s16 = int_to_ptr.vmem [resolvable:$true] %s28_s16  ;;  %s19_s18 = int_to_ptr.vmem [resolvable:$true] %s18_s18 }
   0x3   :  { %s110_s19 = scalar_lea.vmem %s29_s16, 64  ;;  %p115_p1 = scmp.lt.s32.totalorder %s29_s16, %s29_s16 }
   0x4   :  { %p111_p0 = scmp.ne.s32.totalorder %s29_s16, %s110_s19  ;;  %p116_p2 = scmp.lt.s32.totalorder %s110_s19, %s110_s19 }
   0x6   :  { %p117_p3 = por %p116_p2, %p115_p1 }
   0x8   :  { %p118_p4 = pnand %p117_p3, %p111_p0 }
   0xa   :  { %121 = shalt.err (!%p118_p4)
}
   0xb   :  { %31 = dma.hbm_to_vmem [thread:$0]  %s213_s1, 64, %s29_s16, [#allocation5]  }
   0xc   :  { %s130_s22 = scalar_lea.vmem %s19_s18, 64  ;;  %p135_p6 = scmp.lt.s32.totalorder %s19_s18, %s19_s18 }
   0xd   :  { %p131_p5 = scmp.ne.s32.totalorder %s19_s18, %s130_s22  ;;  %p136_p7 = scmp.lt.s32.totalorder %s130_s22, %s130_s22 }
   0xf   :  { %p137_p8 = por %p136_p7, %p135_p6 }
  0x11   :  { %p138_p9 = pnand %p137_p8, %p131_p5 }
  0x13   :  { %141 = shalt.err (!%p138_p9)
}
  0x14   :  { %21 = dma.hbm_to_vmem [thread:$0]  %s212_s0, 64, %s19_s18, [#allocation3]  }
  0x15   :  { %s168_s25 = smov [#allocation6]  }
  0x16   :  { %s38_s26 = sshll.u32 %s168_s25, 4  ;;  %s39_s26 = int_to_ptr.vmem [resolvable:$true] %s38_s26 }
  0x17   :  { %s150_s27 = scalar_lea.vmem %s39_s26, 64  ;;  %p155_p11 = scmp.lt.s32.totalorder %s39_s26, %s39_s26 }
  0x18   :  { %p151_p10 = scmp.ne.s32.totalorder %s39_s26, %s150_s27  ;;  %p156_p12 = scmp.lt.s32.totalorder %s150_s27, %s150_s27 }
  0x1a   :  { %p157_p13 = por %p156_p12, %p155_p11 }
  0x1c   :  { %p158_p0 = pnand %p157_p13, %p151_p10 }
  0x1e   :  { %161 = shalt.err (!%p158_p0)
}
  0x1f   :  { %41 = dma.hbm_to_vmem [thread:$0]  %s214_s2, 64, %s39_s26, [#allocation5]  }
  0x20   :  { %162 = dma.done.wait [#allocation3], 64  }
  0x21   :  { %163 = vsyncadd [#allocation3], 4294967232 }
  0x22   :  { %164 = dma.done.wait [#allocation5], 128  }
  0x23   :  { %165 = vsyncadd [#allocation5], 4294967168  ;;  %v53_v0 = vld [vmem:[#allocation4] sm:$0xf]  ;;  %v169_v1 = vmov 0.0   ;;  %s170_s0 = smov 16   ;;  %v64_v7 = vlaneseq }
  0x24   :  { %vm54_vm0 = vcmp.gt.s32.totalorder %v53_v0, 0  ;;  %vm57_vm1 = vcmask 1047680   ;;  %s171_s29 = smov 113   ;;  %v51_v8 = vld [vmem:[#allocation2] sm:$0xf]  ;;  %vm75_vm3 = vcmask 125952  }
  0x25   :  { %v95_v2 = vsel %vm54_vm0, 1.0, %v169_v1  ;;  %v65_v9 = vand.u32 127, %v64_v7  ;;  %v72_v10 = vsub.f32 0.0, %v51_v8  ;;  %v52_v11 = vld [vmem:[#allocation6] sm:$0xf]  ;;  %vm79_vm4 = vcmask 3072  }
  0x26   :  { %58 = vrot.lane.b32.xlu0 %v95_v2, %s170_s0 }
  0x27   :  { %vm66_vm2 = vcmp.eq.s32.totalorder %v65_v9, 0  ;;  %v73_v12 = vmul.f32 %v72_v10, %v52_v11 }
  0x98   :  { %v59_v3 = vpop.permute.xlu0 %58 }
  0x99   :  { %v60_v4 = vsel %vm57_vm1, %v59_v3, %v95_v2 }
  0x9a   :  { %61 = vrot.lane.b32.xlu0 %v60_v4, %s170_s0 }
 0x10c   :  { %v62_v5 = vpop.permute.xlu0 %61 }
 0x10d   :  { %v63_v6 = vsel %vm57_vm1, %v62_v5, %v95_v2 }
 0x10e   :  { %68 = vrot.lane.b32.xlu1 %v63_v6, %s171_s29 }
 0x180   :  { %v69_v13 = vpop.permute.xlu1 %68 }
 0x181   :  { %v71_v14 = vsel %vm66_vm2, 1.0, %v69_v13 }
 0x182   :  { %v74_v15 = vmul.f32 %v73_v12, %v71_v14  ;;  %v81_v16 = vsel %vm75_vm3, %v71_v14, 0.0 }
 0x183   :  { %82 = vadd.xlane.f32.xlu0 %v81_v16 }
 0x184   :  { %v76_v17 = vsel %vm75_vm3, %v74_v15, 0.0 }
 0x185   :  { %77 = vadd.xlane.f32.xlu1 %v76_v17 }
 0x20c   :  { %v83_v18 = vpop.xlane.xlu0 %82 }
 0x20d   :  { %84 = vst.msk [vmem:[%s216_s4] sm:$0xf] %vm79_vm4, %v83_v18 }
 0x20e   :  { %v78_v19 = vpop.xlane.xlu1 %77 }
 0x20f   :  { %80 = vst.msk [vmem:[%s215_s3] sm:$0xf] %vm79_vm4, %v78_v19 }
 0x210   :  { %93 = vsyncpa [#allocation3], 1 }
 0x211   :  { %94 = vsyncpa [#allocation5], 1 }

</bundles_post_ra>
